<compile_context>
chip_gen: v5e
topology: v5e:2x2
jax: 0.10.0
libtpu: 0.0.40
codegen_flags: <defaults>
</compile_context>

<pallas_src>
import functools

import jax
import jax.numpy as jnp
from jax.experimental import pallas as pl
from jax.experimental.pallas import tpu as pltpu

LANES = 128          # TPU lane width
HIDDEN = 32          # hidden size fixed by the module
MAX_TILE_B = 1024    # max batch rows per grid step (well under VMEM budgets)

# Packed-parameter slab layout (rows; 128 lanes each; all offsets 8-aligned):
OFF_W2 = 0           # rows [0, 128): w2 zero-padded to (128, 128)
OFF_B1 = 128         # row  128     : b1 (lanes 0..31)
OFF_B2 = 136         # row  136     : b2 (lanes 0..A-1)
OFF_W1 = 144         # rows [144, 144 + round_up(S, 8)): w1 zero-padded on lanes >= 32


def _round_up(n, m):
    return ((n + m - 1) // m) * m


def _mlp_kernel(x_ref, p_ref, out_ref, *, s_pad, action_size, apply_softmax):
    # x_ref : (tile_b, s_pad)          states (K padded with zeros to s_pad)
    # p_ref : (144 + s_pad, 128)       packed weights/biases (resident across grid)
    # out   : (tile_b, action_size)
    x = x_ref[...]

    w1 = p_ref[OFF_W1:OFF_W1 + s_pad, :]      # (s_pad, 128), cols >= 32 are 0
    b1 = p_ref[OFF_B1:OFF_B1 + 1, :]          # (1, 128),     lanes >= 32 are 0
    w2 = p_ref[OFF_W2:OFF_W2 + LANES, :]      # (128, 128),   cols >= A are 0
    b2 = p_ref[OFF_B2:OFF_B2 + 1, :]          # (1, 128),     lanes >= A are 0

    # Hidden layer (MXU, f32 accumulate) + ReLU. Padding lanes stay exactly 0.
    h = jnp.dot(x, w1, preferred_element_type=jnp.float32) + b1
    h = jnp.maximum(h, 0.0)

    # Output layer. Lanes >= action_size of `logits` are exactly 0.
    logits = jnp.dot(h, w2, preferred_element_type=jnp.float32) + b2   # (tile_b, 128)

    if apply_softmax:
        # Softmax over the first `action_size` lanes only (mask lane padding).
        lane = jax.lax.broadcasted_iota(jnp.int32, logits.shape, 1)
        masked = jnp.where(lane < action_size, logits, jnp.float32(-1e30))
        m = jnp.max(masked, axis=-1, keepdims=True)
        e = jnp.exp(masked - m)                       # padded lanes underflow to 0
        denom = jnp.sum(e, axis=-1, keepdims=True)
        probs = e / denom                             # exact normalization
        out_ref[...] = probs[:, :action_size]
    else:
        out_ref[...] = logits[:, :action_size]


def pack_params(w1, b1, w2, b2):
    """Pack (in,out)-layout params into one lane-dense (144+round_up(S,8), 128) f32 slab."""
    w1 = jnp.asarray(w1, jnp.float32)
    b1 = jnp.asarray(b1, jnp.float32).reshape(-1)
    w2 = jnp.asarray(w2, jnp.float32)
    b2 = jnp.asarray(b2, jnp.float32).reshape(-1)
    S, H = w1.shape
    H2, A = w2.shape
    assert H == HIDDEN and H2 == HIDDEN and S <= LANES and A <= LANES
    s_pad = _round_up(S, 8)
    p = jnp.zeros((OFF_W1 + s_pad, LANES), jnp.float32)
    p = p.at[OFF_W2:OFF_W2 + H, :A].set(w2)
    p = p.at[OFF_B1, :H].set(b1)
    p = p.at[OFF_B2, :A].set(b2)
    p = p.at[OFF_W1:OFF_W1 + S, :H].set(w1)
    return p


def _choose_tile(B):
    """Static tile choice: large tiles for overhead amortization, >=2 tiles
    whenever more than one is needed (lets v7x shard the batch over 2 TCs)."""
    if B <= 8:
        return 8
    return min(MAX_TILE_B, _round_up(pl.cdiv(B, 2), 8))


@functools.partial(jax.jit, static_argnames=("state_size", "action_size"))
def mlp_forward_batched(x, packed, *, state_size, action_size):
    """Batched forward: x is (B, state_size) -> (B, action_size) f32."""
    B = x.shape[0]
    s_pad = _round_up(state_size, 8)
    assert packed.shape == (OFF_W1 + s_pad, LANES)

    tile_b = _choose_tile(B)
    n_tiles = pl.cdiv(B, tile_b)
    b_pad = n_tiles * tile_b

    x = x.astype(jnp.float32)
    pad_rows = b_pad - B
    pad_k = s_pad - state_size
    if pad_rows or pad_k:
        # Tiny remainder-only padding (no full lane-dense slab materialization).
        x = jnp.pad(x, ((0, pad_rows), (0, pad_k)))

    kernel = functools.partial(
        _mlp_kernel,
        s_pad=s_pad,
        action_size=action_size,
        apply_softmax=(action_size != 1),
    )

    out = pl.pallas_call(
        kernel,
        out_shape=jax.ShapeDtypeStruct((b_pad, action_size), jnp.float32),
        grid_spec=pltpu.PrefetchScalarGridSpec(
            num_scalar_prefetch=0,
            grid=(n_tiles,),
            in_specs=[
                pl.BlockSpec((tile_b, s_pad), lambda i: (i, 0)),          # states tile
                pl.BlockSpec((OFF_W1 + s_pad, LANES), lambda i: (0, 0)),  # weights resident
            ],
            out_specs=pl.BlockSpec((tile_b, action_size), lambda i: (i, 0)),
        ),
        compiler_params=pltpu.CompilerParams(
            dimension_semantics=("parallel",),   # v7x: shard batch tiles across both TCs
        ),
    )(x, packed)

    return out[:B] if b_pad != B else out


def neural_network_forward(state, packed, *, state_size, action_size):
    """Module semantics: single state -> unsqueeze(0) -> (1, action_size)."""
    x = jnp.asarray(state, jnp.float32).reshape(1, state_size)
    return mlp_forward_batched(
        x, packed, state_size=state_size, action_size=action_size
    )


def init_params(key, state_size, action_size, hidden=HIDDEN):
    """Deterministic PyTorch-style (uniform +-1/sqrt(fan_in)) init, (in,out) layout."""
    k1, k2, k3, k4 = jax.random.split(key, 4)
    bound1 = 1.0 / jnp.sqrt(state_size)
    bound2 = 1.0 / jnp.sqrt(hidden)
    w1 = jax.random.uniform(k1, (state_size, hidden), jnp.float32, -bound1, bound1)
    b1 = jax.random.uniform(k2, (1, hidden), jnp.float32, -bound1, bound1)
    w2 = jax.random.uniform(k3, (hidden, action_size), jnp.float32, -bound2, bound2)
    b2 = jax.random.uniform(k4, (1, action_size), jnp.float32, -bound2, bound2)
    return w1, b1, w2, b2


if __name__ == "__main__":
    state_size, action_size = 8, 4

    key = jax.random.PRNGKey(0)
    k_params, k_x, k_xb, k_params_c = jax.random.split(key, 4)

    # --- Actor head (softmax) ---
    w1, b1, w2, b2 = init_params(k_params, state_size, action_size)
    packed = pack_params(w1, b1, w2, b2)

    # Single state (mimics torch.from_numpy(x).float().unsqueeze(0))
    state = jax.random.normal(k_x, (state_size,), jnp.float32)
    out1 = neural_network_forward(
        state, packed, state_size=state_size, action_size=action_size
    )
    out1 = jax.block_until_ready(out1)

    x1 = state[None, :]
    ref1 = jax.nn.softmax(jnp.maximum(x1 @ w1 + b1, 0.0) @ w2 + b2, axis=1)
    assert out1.shape == (1, action_size)
    assert jnp.allclose(out1, ref1, atol=1e-3, rtol=1e-3)

    # Batched rollout path (exercises 2-tile grid, remainder-row padding)
    B = 300
    xb = jax.random.normal(k_xb, (B, state_size), jnp.float32)
    outb = mlp_forward_batched(
        xb, packed, state_size=state_size, action_size=action_size
    )
    outb = jax.block_until_ready(outb)
    refb = jax.nn.softmax(jnp.maximum(xb @ w1 + b1, 0.0) @ w2 + b2, axis=1)
    assert outb.shape == (B, action_size)
    assert jnp.allclose(outb, refb, atol=1e-3, rtol=1e-3)
    # Softmax rows sum to 1 (exact divide in kernel)
    assert jnp.allclose(jnp.sum(outb, axis=1), 1.0, atol=1e-5)

    # --- Critic head (action_size == 1 -> no softmax) ---
    w1c, b1c, w2c, b2c = init_params(k_params_c, state_size, 1)
    packedc = pack_params(w1c, b1c, w2c, b2c)
    outc = neural_network_forward(state, packedc, state_size=state_size, action_size=1)
    outc = jax.block_until_ready(outc)
    refc = jnp.maximum(x1 @ w1c + b1c, 0.0) @ w2c + b2c
    assert outc.shape == (1, 1)
    assert jnp.allclose(outc, refc, atol=1e-3, rtol=1e-3)

    print("KERNEL_OK")
</pallas_src>

<mosaic_0001>
module attributes {stable_mosaic.version = 11 : i64} {
  func.func @_mlp_kernel(%arg0: i32, %arg1: memref<8x8xf32, #tpu.memory_space<vmem>>, %arg2: memref<152x128xf32, #tpu.memory_space<vmem>>, %arg3: memref<8x4xf32, #tpu.memory_space<vmem>>) attributes {dimension_semantics = [#tpu.dimension_semantics<parallel>], iteration_bounds = array<i64: 1>, scalar_prefetch = 0 : i64, scratch_operands = 0 : i64, tpu.core_type = #tpu.core_type<tc>, window_params = [{transform_indices = @transform_0, window_bounds = array<i64: 8, 8>}, {pipeline_mode = #tpu.pipeline_mode<synchronous>, transform_indices = @transform_1, window_bounds = array<i64: 152, 128>}, {transform_indices = @transform_2, window_bounds = array<i64: 8, 4>}]} {
    %c0 = arith.constant 0 : index
    %c0_0 = arith.constant 0 : index
    %0 = vector.load %arg1[%c0, %c0_0] : memref<8x8xf32, #tpu.memory_space<vmem>>, vector<8x8xf32>
    %c144 = arith.constant 144 : index
    %c0_1 = arith.constant 0 : index
    %1 = vector.load %arg2[%c144, %c0_1] : memref<152x128xf32, #tpu.memory_space<vmem>>, vector<8x128xf32>
    %c128 = arith.constant 128 : index
    %c0_2 = arith.constant 0 : index
    %2 = vector.load %arg2[%c128, %c0_2] : memref<152x128xf32, #tpu.memory_space<vmem>>, vector<1x128xf32>
    %c0_3 = arith.constant 0 : index
    %c0_4 = arith.constant 0 : index
    %3 = vector.load %arg2[%c0_3, %c0_4] : memref<152x128xf32, #tpu.memory_space<vmem>>, vector<128x128xf32>
    %c136 = arith.constant 136 : index
    %c0_5 = arith.constant 0 : index
    %4 = vector.load %arg2[%c136, %c0_5] : memref<152x128xf32, #tpu.memory_space<vmem>>, vector<1x128xf32>
    %cst = arith.constant dense<0.000000e+00> : vector<8x128xf32>
    %5 = tpu.matmul %0, %1, %cst {dimension_numbers = #tpu.dot_dimension_numbers<[1], [0], [0], [1], [0, 0, 1, 1], [], []>} : vector<8x8xf32>, vector<8x128xf32>, vector<8x128xf32> -> vector<8x128xf32>
    %6 = vector.broadcast %2 : vector<1x128xf32> to vector<8x128xf32>
    %7 = arith.addf %5, %6 : vector<8x128xf32>
    %cst_6 = arith.constant 0.000000e+00 : f32
    %8 = vector.broadcast %cst_6 : f32 to vector<8x128xf32>
    %9 = arith.maximumf %7, %8 : vector<8x128xf32>
    %cst_7 = arith.constant dense<0.000000e+00> : vector<8x128xf32>
    %10 = tpu.matmul %9, %3, %cst_7 {dimension_numbers = #tpu.dot_dimension_numbers<[1], [0], [0], [1], [0, 0, 1, 1], [], []>} : vector<8x128xf32>, vector<128x128xf32>, vector<8x128xf32> -> vector<8x128xf32>
    %11 = vector.broadcast %4 : vector<1x128xf32> to vector<8x128xf32>
    %12 = arith.addf %10, %11 : vector<8x128xf32>
    %13 = tpu.iota {dimensions = array<i32: 1>} : vector<8x128xi32>
    %c4_i32 = arith.constant 4 : i32
    %14 = vector.broadcast %c4_i32 : i32 to vector<8x128xi32>
    %15 = arith.cmpi slt, %13, %14 : vector<8x128xi32>
    %cst_8 = arith.constant -1.000000e+30 : f32
    %16 = vector.broadcast %cst_8 : f32 to vector<8x128xf32>
    %17 = arith.select %15, %12, %16 : vector<8x128xi1>, vector<8x128xf32>
    %cst_9 = arith.constant dense<0xFF800000> : vector<8xf32>
    %18 = vector.multi_reduction <maximumf>, %17, %cst_9 [1] : vector<8x128xf32> to vector<8xf32>
    %19 = vector.shape_cast %18 : vector<8xf32> to vector<8x1xf32>
    %20 = vector.broadcast %19 : vector<8x1xf32> to vector<8x128xf32>
    %21 = arith.subf %17, %20 : vector<8x128xf32>
    %22 = math.exp %21 : vector<8x128xf32>
    %cst_10 = arith.constant dense<0.000000e+00> : vector<8xf32>
    %23 = vector.multi_reduction <add>, %22, %cst_10 [1] : vector<8x128xf32> to vector<8xf32>
    %24 = vector.shape_cast %23 : vector<8xf32> to vector<8x1xf32>
    %25 = vector.broadcast %24 : vector<8x1xf32> to vector<8x128xf32>
    %26 = arith.divf %22, %25 : vector<8x128xf32>
    %27 = vector.extract_strided_slice %26 {offsets = [0, 0], sizes = [8, 4], strides = [1, 1]} : vector<8x128xf32> to vector<8x4xf32>
    %c0_11 = arith.constant 0 : index
    %c0_12 = arith.constant 0 : index
    %28 = vector.load %arg3[%c0_11, %c0_12] : memref<8x4xf32, #tpu.memory_space<vmem>>, vector<8x4xf32>
    tpu.vector_store %arg3[%c0_11, %c0_12], %27 {strides = array<i32>} : memref<8x4xf32, #tpu.memory_space<vmem>>, vector<8x4xf32>,
    return
  }
  func.func @transform_0(%arg0: i32) -> (i32, i32) {
    %c0_i32 = arith.constant 0 : i32
    %c0_i32_0 = arith.constant 0 : i32
    return %arg0, %c0_i32 : i32, i32
  }
  func.func @transform_1(%arg0: i32) -> (i32, i32) {
    %c0_i32 = arith.constant 0 : i32
    %c0_i32_0 = arith.constant 0 : i32
    %c0_i32_1 = arith.constant 0 : i32
    return %c0_i32, %c0_i32_0 : i32, i32
  }
  func.func @transform_2(%arg0: i32) -> (i32, i32) {
    %c0_i32 = arith.constant 0 : i32
    %c0_i32_0 = arith.constant 0 : i32
    return %arg0, %c0_i32 : i32, i32
  }
}

</mosaic_0001>

<bundles_post_ra>
// kernel: mlp_forward_batched.1
= control target key start
LH: loop header
LB: loop body
LE: loop exit
PB: predicated region body
PF: predicated region fallthrough
CT: control target
= control target key end

     0   :  { %7 = vsyncpa [#allocation3], 0  ;;  %s163_s12 = smov [#allocation2]   ;;  %s164_s14 = smov 128   ;;  %s190_s0 = inlined_call_operand.vmem [shape: f32[8,8], index: 0, kind: input, shape index: {}]   ;;  %s191_s1 = inlined_call_operand.hbm [shape: f32[152,128], index: 1, kind: input, shape index: {}]   ;;  %s192_s2 = inlined_call_operand.vmem [shape: f32[8,4], index: 2, kind: output, shape index: {}]  }
   0x1   :  { %s14_s11 = sshll.u32 %s191_s1, 4  ;;  %s16_s13 = sshll.u32 %s163_s12, 4  ;;  %s15_s11 = int_to_ptr.hbm [resolvable:$true] %s14_s11  ;;  %s17_s13 = int_to_ptr.vmem [resolvable:$true] %s16_s13 }
   0x2   :  { %s165_s15 = smov 8  }
   0x3   :  { %22 = dma.hbm_to_vmem [thread:$0]  %s15_s11, 2432, %s17_s13, [#allocation3], %s164_s14, %s164_s14, %s165_s15  }
   0x4   :  { %161 = dma.done.wait [#allocation3], 2432  }
   0x5   :  { %162 = vsyncadd [#allocation3], 4294964864  ;;  %vm48_vm0 = vcmask 64512   ;;  %v28_v0 = vld [vmem:[#allocation2 + $0x90] sm:$0xff]  ;;  %v27_v1 = vld [vmem:[%s190_s0] sm:$0xff]  ;;  %v94_v22 = vlaneseq  ;;  %vm120_vm6 = vcmask 31744  }
   0x6   :  { %v45_v2 = vld [vmem:[#allocation2 + $0x78] sm:$0xff]  ;;  %67 = vmatpush.msra.mxu0 %v28_v0  ;;  %v44_v3 = vld [vmem:[#allocation2 + $0x70] sm:$0xff]  ;;  %v43_v4 = vld [vmem:[#allocation2 + $0x68] sm:$0xff] }
   0x7   :  { %74 = vmatpush.msra.mxu1 %v45_v2  ;;  %127 = vmatmul.msk.f32.vlgmr.msra.gmra.mxu0 %vm48_vm0, %v27_v1  ;;  %v42_v5 = vld [vmem:[#allocation2 + $0x60] sm:$0xff]  ;;  %v41_v6 = vld [vmem:[#allocation2 + $0x58] sm:$0xff]  ;;  %v40_v7 = vld [vmem:[#allocation2 + $0x50] sm:$0xff]  ;;  %v95_v23 = vand.u32 127, %v94_v22 }
   0x8   :  { %v39_v8 = vld [vmem:[#allocation2 + $0x48] sm:$0xff]  ;;  %v38_v9 = vld [vmem:[#allocation2 + $0x40] sm:$0xff]  ;;  %v37_v10 = vld [vmem:[#allocation2 + $0x38] sm:$0xff] }
   0x9   :  { %75 = vmatpush.msra.mxu1 %v44_v3  ;;  %v36_v11 = vld [vmem:[#allocation2 + $0x30] sm:$0xff]  ;;  %v35_v12 = vld [vmem:[#allocation2 + $0x28] sm:$0xff]  ;;  %v34_v13 = vld [vmem:[#allocation2 + $0x20] sm:$0xff]  ;;  %vm96_vm1 = vcmp.lt.s32.totalorder %v95_v23, 4 }
   0xa   :  { %v33_v14 = vld [vmem:[#allocation2 + $0x18] sm:$0xff]  ;;  %v32_v15 = vld [vmem:[#allocation2 + $0x10] sm:$0xff]  ;;  %v31_v16 = vld [vmem:[#allocation2 + $0x8] sm:$0xff] }
   0xb   :  { %76 = vmatpush.msra.mxu1 %v43_v4  ;;  %v30_v17 = vld [vmem:[#allocation2] sm:$0xff]  ;;  %v132_v24 = vld [vmem:[#allocation2 + $0x88] ss:$0 sm:$0xff] }
   0xc   :  { %v131_v18 = vld [vmem:[#allocation2 + $0x80] ss:$0 sm:$0xff] }
   0xd   :  { %77 = vmatpush.msra.mxu1 %v42_v5 }
   0xf   :  { %78 = vmatpush.msra.mxu1 %v41_v6 }
  0x11   :  { %79 = vmatpush.msra.mxu1 %v40_v7 }
  0x13   :  { %80 = vmatpush.msra.mxu1 %v39_v8 }
  0x15   :  { %81 = vmatpush.msra.mxu1 %v38_v9 }
  0x17   :  { %82 = vmatpush.msra.mxu1 %v37_v10 }
  0x19   :  { %83 = vmatpush.msra.mxu1 %v36_v11 }
  0x1b   :  { %84 = vmatpush.msra.mxu1 %v35_v12 }
  0x1d   :  { %85 = vmatpush.msra.mxu1 %v34_v13 }
  0x1f   :  { %86 = vmatpush.msra.mxu1 %v33_v14 }
  0x21   :  { %87 = vmatpush.msra.mxu1 %v32_v15 }
  0x23   :  { %88 = vmatpush.msra.mxu1 %v31_v16 }
  0x25   :  { %89 = vmatpush.msra.mxu1 %v30_v17 }
  0x84   :  { %v69_v19 = vpop.f32.mrf.mxu0 }
  0x85   :  { %v70_v20 = vadd.f32 %v131_v18, %v69_v19 }
  0x87   :  { %v72_v21 = vmax.f32 %v70_v20, 0.0 }
  0x89   :  { %90 = vmatmul.f32.vlgmr.msra.gmra.mxu1 %v72_v21 }
 0x106   :  { %v91_v25 = vpop.f32.mrf.mxu1 }
 0x107   :  { %v92_v26 = vadd.f32 %v132_v24, %v91_v25 }
 0x109   :  { %v97_v27 = vsel %vm96_vm1, %v92_v26, -1e+30 }
 0x10a   :  { %98 = vmax.xlane.f32.xlu0 %v97_v27 }
 0x17d   :  { %v99_v28 = vpop.xlane.xlu0 %98 }
 0x17e   :  { %v100_v29 = vsub.f32 %v97_v27, %v99_v28 }
 0x180   :  { %v101_v30 = vmul.f32 1.442695, %v100_v29 }
 0x182   :  { %133 = vpow2.f32 %v101_v30 }
 0x188   :  { %v134_v31 = vpop.eup %133 }
 0x189   :  { %103 = vadd.xlane.f32.xlu0 %v134_v31 }
 0x1fc   :  { %v104_v32 = vpop.xlane.xlu0 %103 }
 0x1fd   :  { %135 = vrcp.f32 %v104_v32  ;;  %v116_v36 = vand.u32 2147483648, %v104_v32  ;;  %v114_v38 = vand.u32 2147483647, %v104_v32  ;;  %vm110_vm3 = vweird.f32 %v104_v32 }
 0x1ff   :  { %v117_v40 = vor.u32 1.1754944e-38, %v116_v36  ;;  %vm115_vm5 = vcmp.eq.f32.partialorder %v114_v38, 8.507059e+37 }
 0x203   :  { %v136_v33 = vpop.eup %135 }
 0x204   :  { %v106_v34 = vmul.f32 %v136_v33, %v104_v32  ;;  %vm111_vm2 = vweird.f32 %v136_v33 }
 0x205   :  { %vm112_vm4 = vmor %vm110_vm3, %vm111_vm2 }
 0x206   :  { %v107_v35 = vsub.f32 1.0, %v106_v34 }
 0x208   :  { %v108_v37 = vmul.f32 %v136_v33, %v107_v35 }
 0x20a   :  { %v109_v39 = vadd.f32 %v136_v33, %v108_v37 }
 0x20c   :  { %v113_v41 = vsel %vm112_vm4, %v136_v33, %v109_v39 }
 0x20d   :  { %v118_v42 = vsel %vm115_vm5, %v117_v40, %v113_v41 }
 0x20e   :  { %v119_v43 = vmul.f32 %v134_v31, %v118_v42 }
 0x210   :  { %121 = vst.msk [vmem:[%s192_s2] sm:$0xff] %vm120_vm6, %v119_v43 }
 0x211   :  { %126 = vsyncpa [#allocation3], 1 }

</bundles_post_ra>
